<compile_context>
chip_gen: v6e
topology: v6e:2x2x1
jax: 0.10.0
libtpu: 0.0.40
codegen_flags: <defaults>
</compile_context>

<pallas_src>
import functools

import jax
import jax.numpy as jnp
from jax.experimental import pallas as pl
from jax.experimental.pallas import tpu as pltpu


# ---------------------------------------------------------------------------
# Kernel: one (tile_m, tile_n) output block, accumulated over the K grid axis.
# ---------------------------------------------------------------------------
def _linear_kernel(x_ref, w_ref, b_ref, o_ref, acc_ref, *,
                   negative_slope, apply_act):
    k = pl.program_id(2)

    @pl.when(k == 0)
    def _init():
        acc_ref[...] = jnp.zeros_like(acc_ref)

    acc_ref[...] += jnp.dot(x_ref[...], w_ref[...],
                            preferred_element_type=jnp.float32)

    @pl.when(k == pl.num_programs(2) - 1)
    def _finalize():
        y = acc_ref[...] + b_ref[...]          # bias add in f32
        if apply_act:
            y = jnp.where(y >= 0, y, negative_slope * y)   # LeakyReLU
        o_ref[...] = y.astype(o_ref.dtype)


# ---------------------------------------------------------------------------
# Wrapper: pad to aligned tiles, launch the tiled matmul, slice padding off.
# ---------------------------------------------------------------------------
def _round_up(x, m):
    return ((x + m - 1) // m) * m


def _pad2(a, rows, cols):
    pr, pc = rows - a.shape[0], cols - a.shape[1]
    if pr or pc:
        a = jnp.pad(a, ((0, pr), (0, pc)))
    return a


def linear_layer(x, w_t, b, *, apply_act, negative_slope=0.2,
                 compute_dtype=jnp.float32,
                 tile_m=256, tile_n=256, tile_k=512):
    """y = act(x @ w_t + b).  x: (M, K) f32, w_t: (K, N) f32, b: (N,) f32."""
    M, K = x.shape
    K2, N = w_t.shape
    assert K == K2 and b.shape[-1] == N

    # Clamp tiles to the (padded) problem, keeping alignment:
    #   M tile: multiple of 16 (covers bf16 sublane packing),
    #   N / K tiles: multiples of 128 (lane-dense stores, full MXU columns).
    tm = min(tile_m, _round_up(M, 16))
    tn = min(tile_n, _round_up(N, 128))
    tk = min(tile_k, _round_up(K, 128))

    Mp, Kp, Np = _round_up(M, tm), _round_up(K, tk), _round_up(N, tn)

    # Cast MXU operands in the wrapper (halves HBM DMA bytes when bf16);
    # bias / accumulation / activation stay in f32.
    xp = _pad2(x.astype(compute_dtype), Mp, Kp)
    wp = _pad2(w_t.astype(compute_dtype), Kp, Np)
    bp = _pad2(b.astype(jnp.float32).reshape(1, N), 1, Np)

    grid = (Mp // tm, Np // tn, Kp // tk)

    kernel = functools.partial(_linear_kernel,
                               negative_slope=negative_slope,
                               apply_act=apply_act)

    itemsize = jnp.dtype(compute_dtype).itemsize
    flops = 2 * M * K * N
    bytes_accessed = (xp.size + wp.size) * itemsize + (bp.size + Mp * Np) * 4

    # Double-buffered x/w/b/out tiles + f32 accumulator, plus headroom.
    vmem_bytes = (2 * (tm * tk + tk * tn) * itemsize
                  + 2 * (tn + tm * tn) * 4
                  + tm * tn * 4 + (2 << 20))
    vmem_limit = int(min(max(vmem_bytes, 16 << 20), 48 << 20))

    out = pl.pallas_call(
        kernel,
        out_shape=jax.ShapeDtypeStruct((Mp, Np), jnp.float32),
        grid_spec=pltpu.PrefetchScalarGridSpec(
            num_scalar_prefetch=0,
            grid=grid,
            in_specs=[
                pl.BlockSpec((tm, tk), lambda i, j, k: (i, k)),
                pl.BlockSpec((tk, tn), lambda i, j, k: (k, j)),
                pl.BlockSpec((1, tn), lambda i, j, k: (0, j)),
            ],
            out_specs=pl.BlockSpec((tm, tn), lambda i, j, k: (i, j)),
            scratch_shapes=[pltpu.VMEM((tm, tn), jnp.float32)],
        ),
        compiler_params=pltpu.CompilerParams(
            dimension_semantics=("parallel", "parallel", "arbitrary"),
            vmem_limit_bytes=vmem_limit,
        ),
        cost_estimate=pl.CostEstimate(flops=flops, transcendentals=0,
                                      bytes_accessed=bytes_accessed),
    )(xp, wp, bp)

    return out[:M, :N]


# ---------------------------------------------------------------------------
# MLP forward (matches the PyTorch module).
# ---------------------------------------------------------------------------
def mlp_forward(x, params, *, input_dim, output_dim, negative_slope=0.2,
                use_activation=True, compute_dtype=jnp.float32):
    """params: list of (w_t, b) with w_t of shape (in, out), b of shape (out,).
    Activation is applied after every hidden layer, not after the output layer
    (use_activation=False reproduces `activation=None`)."""
    batch = x.shape[0]
    h = x.reshape(-1, input_dim)
    n_layers = len(params)
    for idx, (w_t, b) in enumerate(params):
        apply_act = use_activation and (idx < n_layers - 1)
        h = linear_layer(h, w_t, b, apply_act=apply_act,
                         negative_slope=negative_slope,
                         compute_dtype=compute_dtype)
    return h.reshape(batch, -1, output_dim)


def mlp_reference(x, params, *, input_dim, output_dim, negative_slope=0.2,
                  use_activation=True):
    h = x.reshape(-1, input_dim)
    n_layers = len(params)
    for idx, (w_t, b) in enumerate(params):
        h = jnp.dot(h, w_t, precision=jax.lax.Precision.HIGHEST) + b
        if use_activation and idx < n_layers - 1:
            h = jnp.where(h >= 0, h, negative_slope * h)
    return h.reshape(x.shape[0], -1, output_dim)


def init_mlp_params(key, input_dim, layers, units, output_dim):
    """nn.Linear-style init: U(+/- 1/sqrt(fan_in)). Weights stored pre-transposed."""
    dims = []
    in_size = input_dim
    for _ in range(layers):
        dims.append((in_size, units))
        in_size = units
    dims.append((in_size, output_dim))

    params = []
    for fan_in, fan_out in dims:
        key, kw, kb = jax.random.split(key, 3)
        bound = 1.0 / jnp.sqrt(jnp.float32(fan_in))
        w_t = jax.random.uniform(kw, (fan_in, fan_out), jnp.float32, -bound, bound)
        b = jax.random.uniform(kb, (fan_out,), jnp.float32, -bound, bound)
        params.append((w_t, b))
    return params


if __name__ == "__main__":
    key = jax.random.PRNGKey(0)
    k_x, k_p = jax.random.split(key)

    # Small shapes consistent with the module: x is (batch, seq, input_dim).
    batch, seq = 2, 8
    input_dim, layers, units, output_dim = 32, 2, 64, 16
    negative_slope = 0.2   # activation = nn.LeakyReLU(0.2)

    x = jax.random.normal(k_x, (batch, seq, input_dim), jnp.float32)
    params = init_mlp_params(k_p, input_dim, layers, units, output_dim)

    # f32 path (bit-faithful to the PyTorch f32 Linear).
    out = mlp_forward(x, params, input_dim=input_dim, output_dim=output_dim,
                      negative_slope=negative_slope)
    out = jax.block_until_ready(out)

    ref = mlp_reference(x, params, input_dim=input_dim, output_dim=output_dim,
                        negative_slope=negative_slope)
    assert out.shape == (batch, seq, output_dim)
    assert jnp.allclose(out, ref, atol=1e-4, rtol=1e-4)

    # bf16 MXU-input path (f32 accumulation) — perf mode from the review.
    out_bf16 = mlp_forward(x, params, input_dim=input_dim,
                           output_dim=output_dim,
                           negative_slope=negative_slope,
                           compute_dtype=jnp.bfloat16)
    out_bf16 = jax.block_until_ready(out_bf16)
    assert out_bf16.shape == (batch, seq, output_dim)
    assert jnp.allclose(out_bf16, ref, atol=1e-1, rtol=1e-1)

    print("KERNEL_OK")
</pallas_src>

<mosaic_0001>
module attributes {stable_mosaic.version = 11 : i64} {
  func.func @_linear_kernel(%arg0: i32, %arg1: i32, %arg2: i32, %arg3: memref<16x128xf32, #tpu.memory_space<vmem>>, %arg4: memref<128x128xf32, #tpu.memory_space<vmem>>, %arg5: memref<1x128xf32, #tpu.memory_space<vmem>>, %arg6: memref<16x128xf32, #tpu.memory_space<vmem>>, %arg7: memref<16x128xf32, #tpu.memory_space<vmem>>) attributes {dimension_semantics = [#tpu.dimension_semantics<parallel>, #tpu.dimension_semantics<parallel>, #tpu.dimension_semantics<arbitrary>], iteration_bounds = array<i64: 1, 1, 1>, scalar_prefetch = 0 : i64, scratch_operands = 1 : i64, tpu.core_type = #tpu.core_type<tc>, window_params = [{transform_indices = @transform_0, window_bounds = array<i64: 16, 128>}, {transform_indices = @transform_1, window_bounds = array<i64: 128, 128>}, {transform_indices = @transform_2, window_bounds = array<i64: 1, 128>}, {transform_indices = @transform_3, window_bounds = array<i64: 16, 128>}]} {
    %c0_i32 = arith.constant 0 : i32
    %0 = arith.cmpi eq, %arg2, %c0_i32 : i32
    %1 = arith.extui %0 : i1 to i32
    %c0_i32_0 = arith.constant 0 : i32
    %2 = arith.cmpi ne, %1, %c0_i32_0 : i32
    scf.if %2 {
      %cst_10 = arith.constant 0.000000e+00 : f32
      %12 = vector.broadcast %cst_10 : f32 to vector<16x128xf32>
      %c0_11 = arith.constant 0 : index
      %c0_12 = arith.constant 0 : index
      %13 = vector.load %arg7[%c0_11, %c0_12] : memref<16x128xf32, #tpu.memory_space<vmem>>, vector<16x128xf32>
      tpu.vector_store %arg7[%c0_11, %c0_12], %12 {strides = array<i32>} : memref<16x128xf32, #tpu.memory_space<vmem>>, vector<16x128xf32>,
    } else {
    }
    %c0 = arith.constant 0 : index
    %c0_1 = arith.constant 0 : index
    %3 = vector.load %arg7[%c0, %c0_1] : memref<16x128xf32, #tpu.memory_space<vmem>>, vector<16x128xf32>
    %c0_2 = arith.constant 0 : index
    %c0_3 = arith.constant 0 : index
    %4 = vector.load %arg3[%c0_2, %c0_3] : memref<16x128xf32, #tpu.memory_space<vmem>>, vector<16x128xf32>
    %c0_4 = arith.constant 0 : index
    %c0_5 = arith.constant 0 : index
    %5 = vector.load %arg4[%c0_4, %c0_5] : memref<128x128xf32, #tpu.memory_space<vmem>>, vector<128x128xf32>
    %cst = arith.constant dense<0.000000e+00> : vector<16x128xf32>
    %6 = tpu.matmul %4, %5, %cst {dimension_numbers = #tpu.dot_dimension_numbers<[1], [0], [0], [1], [0, 0, 1, 1], [], []>} : vector<16x128xf32>, vector<128x128xf32>, vector<16x128xf32> -> vector<16x128xf32>
    %7 = arith.addf %3, %6 : vector<16x128xf32>
    %c0_6 = arith.constant 0 : index
    %c0_7 = arith.constant 0 : index
    %8 = vector.load %arg7[%c0_6, %c0_7] : memref<16x128xf32, #tpu.memory_space<vmem>>, vector<16x128xf32>
    tpu.vector_store %arg7[%c0_6, %c0_7], %7 {strides = array<i32>} : memref<16x128xf32, #tpu.memory_space<vmem>>, vector<16x128xf32>,
    %c0_i32_8 = arith.constant 0 : i32
    %9 = arith.cmpi eq, %arg2, %c0_i32_8 : i32
    %10 = arith.extui %9 : i1 to i32
    %c0_i32_9 = arith.constant 0 : i32
    %11 = arith.cmpi ne, %10, %c0_i32_9 : i32
    scf.if %11 {
      %c0_10 = arith.constant 0 : index
      %c0_11 = arith.constant 0 : index
      %12 = vector.load %arg7[%c0_10, %c0_11] : memref<16x128xf32, #tpu.memory_space<vmem>>, vector<16x128xf32>
      %c0_12 = arith.constant 0 : index
      %c0_13 = arith.constant 0 : index
      %13 = vector.load %arg5[%c0_12, %c0_13] : memref<1x128xf32, #tpu.memory_space<vmem>>, vector<1x128xf32>
      %14 = vector.broadcast %13 : vector<1x128xf32> to vector<16x128xf32>
      %15 = arith.addf %12, %14 : vector<16x128xf32>
      %cst_14 = arith.constant 0.000000e+00 : f32
      %16 = vector.broadcast %cst_14 : f32 to vector<16x128xf32>
      %17 = arith.cmpf oge, %15, %16 : vector<16x128xf32>
      %cst_15 = arith.constant 2.000000e-01 : f32
      %18 = vector.broadcast %cst_15 : f32 to vector<16x128xf32>
      %19 = arith.mulf %18, %15 : vector<16x128xf32>
      %20 = arith.select %17, %15, %19 : vector<16x128xi1>, vector<16x128xf32>
      %c0_16 = arith.constant 0 : index
      %c0_17 = arith.constant 0 : index
      %21 = vector.load %arg6[%c0_16, %c0_17] : memref<16x128xf32, #tpu.memory_space<vmem>>, vector<16x128xf32>
      tpu.vector_store %arg6[%c0_16, %c0_17], %20 {strides = array<i32>} : memref<16x128xf32, #tpu.memory_space<vmem>>, vector<16x128xf32>,
    } else {
    }
    return
  }
  func.func @transform_0(%arg0: i32, %arg1: i32, %arg2: i32) -> (i32, i32) {
    %c0_i32 = arith.constant 0 : i32
    return %arg0, %arg2 : i32, i32
  }
  func.func @transform_1(%arg0: i32, %arg1: i32, %arg2: i32) -> (i32, i32) {
    %c0_i32 = arith.constant 0 : i32
    return %arg2, %arg1 : i32, i32
  }
  func.func @transform_2(%arg0: i32, %arg1: i32, %arg2: i32) -> (i32, i32) {
    %c0_i32 = arith.constant 0 : i32
    %c0_i32_0 = arith.constant 0 : i32
    return %c0_i32, %arg1 : i32, i32
  }
  func.func @transform_3(%arg0: i32, %arg1: i32, %arg2: i32) -> (i32, i32) {
    %c0_i32 = arith.constant 0 : i32
    return %arg0, %arg1 : i32, i32
  }
}

</mosaic_0001>

<bundles_post_ra>
// kernel: tpu_custom_call.1
= control target key start
LH: loop header
LB: loop body
LE: loop exit
PB: predicated region body
PF: predicated region fallthrough
CT: control target
= control target key end

     0   :  { %8 = vsyncpa [#allocation4], 0  ;;  %s359_s0 = inlined_call_operand.hbm [shape: f32[16,128], index: 0, kind: input, shape index: {}]   ;;  %s360_s1 = inlined_call_operand.hbm [shape: f32[128,128], index: 1, kind: input, shape index: {}]   ;;  %s361_s2 = inlined_call_operand.vmem [shape: f32[1,128], index: 2, kind: input, shape index: {}]   ;;  %s362_s3 = inlined_call_operand.hbm [shape: f32[16,128], index: 3, kind: output, shape index: {}]  }
   0x1   :  { %9 = vsyncpa [#allocation7], 0 }
   0x2   :  { %10 = vsyncpa [#allocation5], 0  ;;  %s313_s12 = smov [#allocation3]  }
   0x3   :  { %s16_s13 = sshll.u32 %s313_s12, 4  ;;  %s17_s13 = int_to_ptr.vmem [resolvable:$true] %s16_s13 }
   0x4   :  { %s255_s14 = scalar_lea.vmem %s17_s13, 256  ;;  %p260_p1 = scmp.lt.s32.totalorder %s17_s13, %s17_s13 }
   0x5   :  { %p256_p0 = scmp.ne.s32.totalorder %s17_s13, %s255_s14  ;;  %p261_p2 = scmp.lt.s32.totalorder %s255_s14, %s255_s14 }
   0x7   :  { %p262_p3 = por %p261_p2, %p260_p1 }
   0x9   :  { %p263_p4 = pnand %p262_p3, %p256_p0 }
   0xb   :  { %266 = shalt.err (!%p263_p4)
}
   0xc   :  { %s314_s15 = smov 128   ;;  %s315_s16 = smov 8  }
   0xd   :  { %22 = dma.hbm_to_vmem [thread:$0]  %s359_s0, 256, %s17_s13, [#allocation4], %s314_s15, %s314_s15, %s315_s16  }
   0xe   :  { %s316_s19 = smov [#allocation6]  }
   0xf   :  { %s28_s20 = sshll.u32 %s316_s19, 4  ;;  %s29_s20 = int_to_ptr.vmem [resolvable:$true] %s28_s20 }
  0x10   :  { %s275_s21 = scalar_lea.vmem %s29_s20, 2048  ;;  %p280_p6 = scmp.lt.s32.totalorder %s29_s20, %s29_s20 }
  0x11   :  { %p276_p5 = scmp.ne.s32.totalorder %s29_s20, %s275_s21  ;;  %p281_p7 = scmp.lt.s32.totalorder %s275_s21, %s275_s21 }
  0x13   :  { %p282_p8 = por %p281_p7, %p280_p6 }
  0x15   :  { %p283_p9 = pnand %p282_p8, %p276_p5 }
  0x17   :  { %286 = shalt.err (!%p283_p9)
}
  0x18   :  { %34 = dma.hbm_to_vmem [thread:$0]  %s360_s1, 2048, %s29_s20, [#allocation7], %s314_s15, %s314_s15, %s315_s16  }
  0x19   :  { %307 = dma.done.wait [#allocation4], 256  }
  0x1a   :  { %308 = vsyncadd [#allocation4], 4294967040 }
  0x1b   :  { %309 = dma.done.wait [#allocation7], 2048  }
  0x1c   :  { %310 = vsyncadd [#allocation7], 4294965248  ;;  %v68_v0 = vld [vmem:[#allocation6 + $0x78] sm:$0xff]  ;;  %v67_v1 = vld [vmem:[#allocation6 + $0x70] sm:$0xff]  ;;  %s317_s24 = smov [#allocation8]  }
  0x1d   :  { %207 = vmatprep.subr.mxu0 %v68_v0  ;;  %v66_v2 = vld [vmem:[#allocation6 + $0x68] sm:$0xff]  ;;  %v65_v3 = vld [vmem:[#allocation6 + $0x60] sm:$0xff]  ;;  %v51_v4 = vld [vmem:[#allocation3] sm:$0xff]  ;;  %s175_s25 = sshll.u32 %s317_s24, 4  ;;  %s176_s25 = int_to_ptr.vmem [resolvable:$true] %s175_s25 }
  0x1e   :  { %208 = vmatpush3.msra.mxu0 %v68_v0  ;;  %v64_v5 = vld [vmem:[#allocation6 + $0x58] sm:$0xff]  ;;  %239 = vmatprep.mubr.f32.mxu0 %v51_v4  ;;  %v63_v6 = vld [vmem:[#allocation6 + $0x50] sm:$0xff]  ;;  %v62_v7 = vld [vmem:[#allocation6 + $0x48] sm:$0xff]  ;;  %s287_s26 = scalar_lea.vmem %s176_s25, 256  ;;  %p292_p11 = scmp.lt.s32.totalorder %s176_s25, %s176_s25 }
  0x1f   :  { %209 = vmatprep.subr.mxu0 %v67_v1  ;;  %v61_v8 = vld [vmem:[#allocation6 + $0x40] sm:$0xff]  ;;  %v60_v9 = vld [vmem:[#allocation6 + $0x38] sm:$0xff]  ;;  %v59_v10 = vld [vmem:[#allocation6 + $0x30] sm:$0xff]  ;;  %p288_p10 = scmp.ne.s32.totalorder %s176_s25, %s287_s26  ;;  %p293_p12 = scmp.lt.s32.totalorder %s287_s26, %s287_s26 }
  0x20   :  { %210 = vmatpush3.msra.mxu0 %v67_v1  ;;  %v58_v11 = vld [vmem:[#allocation6 + $0x28] sm:$0xff]  ;;  %v57_v12 = vld [vmem:[#allocation6 + $0x20] sm:$0xff]  ;;  %v56_v13 = vld [vmem:[#allocation6 + $0x18] sm:$0xff] }
  0x21   :  { %211 = vmatprep.subr.mxu0 %v66_v2  ;;  %v55_v14 = vld [vmem:[#allocation6 + $0x10] sm:$0xff]  ;;  %v54_v15 = vld [vmem:[#allocation6 + $0x8] sm:$0xff]  ;;  %v53_v16 = vld [vmem:[#allocation6] sm:$0xff]  ;;  %p294_p13 = por %p293_p12, %p292_p11 }
  0x22   :  { %212 = vmatpush3.msra.mxu0 %v66_v2  ;;  %v52_v17 = vld [vmem:[#allocation3 + $0x8] sm:$0xff]  ;;  %v188_v18 = vld [vmem:[%s361_s2] ss:$0 sm:$0xff] }
  0x23   :  { %213 = vmatprep.subr.mxu0 %v65_v3  ;;  %p295_p0 = pnand %p294_p13, %p288_p10 }
  0x24   :  { %214 = vmatpush3.msra.mxu0 %v65_v3 }
  0x25   :  { %215 = vmatprep.subr.mxu0 %v64_v5 }
  0x26   :  { %216 = vmatpush3.msra.mxu0 %v64_v5 }
  0x27   :  { %217 = vmatprep.subr.mxu0 %v63_v6 }
  0x28   :  { %218 = vmatpush3.msra.mxu0 %v63_v6 }
  0x29   :  { %219 = vmatprep.subr.mxu0 %v62_v7 }
  0x2a   :  { %220 = vmatpush3.msra.mxu0 %v62_v7 }
  0x2b   :  { %221 = vmatprep.subr.mxu0 %v61_v8 }
  0x2c   :  { %222 = vmatpush3.msra.mxu0 %v61_v8 }
  0x2d   :  { %223 = vmatprep.subr.mxu0 %v60_v9 }
  0x2e   :  { %224 = vmatpush3.msra.mxu0 %v60_v9 }
  0x2f   :  { %225 = vmatprep.subr.mxu0 %v59_v10 }
  0x30   :  { %226 = vmatpush3.msra.mxu0 %v59_v10 }
  0x31   :  { %227 = vmatprep.subr.mxu0 %v58_v11 }
  0x32   :  { %228 = vmatpush3.msra.mxu0 %v58_v11 }
  0x33   :  { %229 = vmatprep.subr.mxu0 %v57_v12 }
  0x34   :  { %230 = vmatpush3.msra.mxu0 %v57_v12 }
  0x35   :  { %231 = vmatprep.subr.mxu0 %v56_v13 }
  0x36   :  { %232 = vmatpush3.msra.mxu0 %v56_v13 }
  0x37   :  { %233 = vmatprep.subr.mxu0 %v55_v14 }
  0x38   :  { %234 = vmatpush3.msra.mxu0 %v55_v14 }
  0x39   :  { %235 = vmatprep.subr.mxu0 %v54_v15 }
  0x3a   :  { %236 = vmatpush3.msra.mxu0 %v54_v15 }
  0x3b   :  { %237 = vmatprep.subr.mxu0 %v53_v16 }
  0x3c   :  { %238 = vmatpush3.msra.mxu0 %v53_v16 }
  0x3d   :  { %240 = vmatmul.mubr.f32.vlgmr.msra.gmra.mxu0 %v52_v17 }
  0xfd   :  { %v241_v19 = vpop.f32.mrf.mxu0 }
  0xfe   :  { %v161_v20 = vadd.f32 %v241_v19, %v188_v18 }
  0xff   :  { %v135_v21 = vpop.f32.mrf.mxu0 }
 0x100   :  { %vm163_vm0 = vcmp.ge.f32.partialorder %v161_v20, 0.0  ;;  %v165_v22 = vmul.f32 0.2, %v161_v20  ;;  %v160_v23 = vadd.f32 %v188_v18, %v135_v21 }
 0x102   :  { %vm162_vm1 = vcmp.ge.f32.partialorder %v160_v23, 0.0  ;;  %v164_v24 = vmul.f32 0.2, %v160_v23  ;;  %v167_v25 = vsel %vm163_vm0, %v161_v20, %v165_v22 }
 0x103   :  { %169 = vst [vmem:[#allocation8 + $0x8] sm:$0xff] %v167_v25 }
 0x104   :  { %v166_v26 = vsel %vm162_vm1, %v160_v23, %v164_v24 }
 0x105   :  { %168 = vst [vmem:[#allocation8] sm:$0xff] %v166_v26 }
 0x106   :  { %298 = shalt.err (!%p295_p0)
}
 0x107   :  { %181 = dma.vmem_to_hbm [thread:$0]  %s176_s25, 256, %s362_s3, [#allocation5], %s314_s15, %s314_s15, %s315_s16  }
 0x108   :  { %311 = dma.done.wait [#allocation5], 256  }
 0x109   :  { %312 = vsyncadd [#allocation5], 4294967040 }
 0x10a   :  { %185 = vsyncpa [#allocation4], 1 }
 0x10b   :  { %186 = vsyncpa [#allocation7], 1 }
 0x10c   :  { %187 = vsyncpa [#allocation5], 1 }

</bundles_post_ra>
